<compile_context>
chip_gen: v7x
topology: tpu7x:2x2x1
jax: 0.10.0
libtpu: 0.0.40
codegen_flags: <defaults>
</compile_context>

<pallas_src>
import functools

import jax
import jax.numpy as jnp
from jax.experimental import pallas as pl
from jax.experimental.pallas import tpu as pltpu

_NEG_BIG = -1e30  # finite "-inf" for padded vocab columns (avoids inf-inf NaN)


def _round_up(x, m):
    return (x + m - 1) // m * m


def _vmem_capacity_bytes():
    """Physical VMEM per TensorCore; conservative 64 MiB fallback (v7x size)."""
    try:
        cap = getattr(pltpu.get_tpu_info(), "vmem_capacity_bytes", None)
        if cap:
            return int(cap)
    except Exception:
        pass
    return 64 * 1024 * 1024


def _pick_tv(v_pad, tv_cap=512):
    """Largest divisor of v_pad (a multiple of 128) that is <= tv_cap.

    Prefers multiples of 256 (full MXU width on v6e/v7x).  Because tv divides
    v_pad = round_up(V, 128), no vocab padding beyond the lane minimum is
    introduced, so the output never carries extra padded columns.
    """
    cap = max(128, min(tv_cap, v_pad))
    cands = [d for d in range(128, cap + 1, 128) if v_pad % d == 0]
    if not cands:
        return 128
    m256 = [d for d in cands if d % 256 == 0]
    return int(max(m256) if m256 else max(cands))


def _pick_tm(m, h, v_pad, tv, tm_req, vmem_budget):
    """Largest row tile (multiple of 16 for bf16 packing) fitting the budget.

    Conservatively assumes Mosaic double-buffers the revisited [tm, V_pad]
    f32 output block as well as the streamed x/weight/bias blocks.
    """
    fixed = 2 * h * tv * 2 + 2 * 8 * tv * 4            # weight + bias buffers
    per_row = 2 * v_pad * 4 + 2 * h * 2                # out (f32 x2) + x (bf16 x2)
    tm_cap = (vmem_budget - fixed) // per_row
    tm_cap = max(16, (tm_cap // 16) * 16)
    tm_eff = min(_round_up(max(int(tm_req), 16), 16), tm_cap, _round_up(m, 16))
    return max(16, int(tm_eff))


def _caption_head_kernel(x_ref, w_ref, b_ref, o_ref, m_ref, s_ref):
    """Fused vocab projection + online log_softmax.

    Grid: (row tiles, vocab tiles); the vocab axis is last and "arbitrary".
      x_ref: [tm, H]      bf16 hidden-state row tile (same for every j)
      w_ref: [H,  tv]     bf16 weight column tile
      b_ref: [1,  tv]     f32 bias column tile (padded cols hold -1e30)
      o_ref: [tm, V_pad]  f32 output block, resident across the vocab sweep
      m_ref: [tm, 1]      f32 running max scratch
      s_ref: [tm, 1]      f32 running sum-exp scratch
    """
    j = pl.program_id(1)
    nv = pl.num_programs(1)
    tv = w_ref.shape[1]

    @pl.when(j == 0)
    def _():
        m_ref[...] = jnp.full_like(m_ref, -jnp.inf)
        s_ref[...] = jnp.zeros_like(s_ref)

    # bf16 x bf16 -> f32 on the MXU; bias added exactly once per vocab column.
    logits = jnp.dot(
        x_ref[...], w_ref[...], preferred_element_type=jnp.float32
    ) + b_ref[...]

    # Online logsumexp update over the tiled vocab axis (all math in f32).
    m_old = m_ref[...]
    m_new = jnp.maximum(m_old, jnp.max(logits, axis=-1, keepdims=True))
    alpha = jnp.exp(m_old - m_new)
    s_ref[...] = alpha * s_ref[...] + jnp.sum(
        jnp.exp(logits - m_new), axis=-1, keepdims=True
    )
    m_ref[...] = m_new

    # Stash raw logits into the resident output block (lane-aligned slice).
    col = pl.multiple_of(j * tv, 128)
    o_ref[:, pl.ds(col, tv)] = logits.astype(o_ref.dtype)

    # Finalize on the last vocab block: subtract the log-partition row-wise.
    @pl.when(j == nv - 1)
    def _():
        lse = m_ref[...] + jnp.log(s_ref[...])
        o_ref[...] = (o_ref[...] - lse).astype(o_ref.dtype)


@functools.partial(
    jax.jit, static_argnames=("v_logical", "tm", "tv", "vmem_limit")
)
def _caption_head_impl(hidden, w_padded, b_padded, *, v_logical, tm, tv,
                       vmem_limit):
    """hidden: [M, H] f32; w_padded: [H, V_pad] bf16; b_padded: [1, V_pad] f32."""
    m, h = hidden.shape
    v_pad = w_padded.shape[1]

    x = hidden.astype(jnp.bfloat16)
    m_pad = _round_up(m, tm)
    if m_pad != m:  # skip the pad copy when M is already tile-aligned
        x = jnp.pad(x, ((0, m_pad - m), (0, 0)))

    num_m = m_pad // tm
    num_v = v_pad // tv

    out = pl.pallas_call(
        _caption_head_kernel,
        out_shape=jax.ShapeDtypeStruct((m_pad, v_pad), jnp.float32),
        grid=(num_m, num_v),
        in_specs=[
            pl.BlockSpec((tm, h), lambda i, j: (i, 0)),   # hidden rows
            pl.BlockSpec((h, tv), lambda i, j: (0, j)),   # weight cols
            pl.BlockSpec((1, tv), lambda i, j: (0, j)),   # bias cols
        ],
        # Output block is resident across the vocab ("arbitrary") axis.
        out_specs=pl.BlockSpec((tm, v_pad), lambda i, j: (i, 0)),
        scratch_shapes=[
            pltpu.VMEM((tm, 1), jnp.float32),  # running max
            pltpu.VMEM((tm, 1), jnp.float32),  # running sum-exp
        ],
        compiler_params=pltpu.CompilerParams(
            dimension_semantics=("parallel", "arbitrary"),
            vmem_limit_bytes=vmem_limit,
        ),
    )(x, w_padded, b_padded)

    # Only strip what was actually padded (no slice at all if fully aligned).
    if m_pad != m or v_pad != v_logical:
        out = out[:m, :v_logical]
    return out


def caption_head(hidden, w_padded, b_padded, vocab_size, *, tm=512, tv_cap=512):
    """Log-softmax vocab head.  Weight/bias must be pre-padded (see model)."""
    m, h = hidden.shape
    v_pad = w_padded.shape[1]
    assert w_padded.shape[0] == h and b_padded.shape == (1, v_pad)
    tv = _pick_tv(v_pad, tv_cap)
    vmem_budget = int(0.72 * _vmem_capacity_bytes())
    tm_eff = _pick_tm(m, h, v_pad, tv, tm, vmem_budget)
    return _caption_head_impl(
        hidden, w_padded, b_padded,
        v_logical=int(vocab_size), tm=tm_eff, tv=tv, vmem_limit=vmem_budget,
    )


class CaptionModel:
    """JAX port of the PyTorch CaptionModel dispatcher base class."""

    def __init__(self, hidden_size=32, vocab_size=128, seed=0):
        key = jax.random.PRNGKey(seed)
        kw, kb = jax.random.split(key)
        # deterministic synthetic parameters for the vocab head (f32 masters)
        self.weight = (
            jax.random.normal(kw, (hidden_size, vocab_size), jnp.float32)
            / jnp.sqrt(jnp.float32(hidden_size))
        )
        self.bias = 0.01 * jax.random.normal(kb, (vocab_size,), jnp.float32)
        self.hidden_size = hidden_size
        self.vocab_size = vocab_size

        # Pre-pad to the 128-lane vocab size and pre-cast to bf16 ONCE, so the
        # per-call wrapper never re-reads/re-writes the [H, V] weight in HBM.
        v_pad = _round_up(vocab_size, 128)
        self.w_padded = jax.block_until_ready(
            jnp.pad(self.weight, ((0, 0), (0, v_pad - vocab_size)))
            .astype(jnp.bfloat16)
        )
        # Padded vocab columns get a huge negative bias so they never affect
        # the max / sum-exp (exact log_softmax over the real V columns).
        self.b_padded = jax.block_until_ready(
            jnp.pad(
                self.bias.astype(jnp.float32),
                (0, v_pad - vocab_size),
                constant_values=_NEG_BIG,
            ).reshape(1, v_pad)
        )

    # --- exact dispatcher semantics of the reference forward() ---
    def forward(self, *args, **kwargs):
        mode = kwargs.get("mode", "forward")
        if "mode" in kwargs:
            del kwargs["mode"]
        return getattr(self, "_" + mode)(*args, **kwargs)

    __call__ = forward

    # --- representative subclass hot path, executed in the Pallas kernel ---
    def _forward(self, hidden_states):
        """hidden_states: [B, T, H] -> log-probs [B, T, V]."""
        B, T, H = hidden_states.shape
        flat = hidden_states.reshape(B * T, H)
        out = caption_head(flat, self.w_padded, self.b_padded, self.vocab_size)
        return out.reshape(B, T, self.vocab_size)


if __name__ == "__main__":
    # Small shapes; V deliberately not 128-aligned (exercises column masking)
    # and large enough to give two tv=512 vocab tiles (exercises online LSE).
    B, T, H, V = 2, 7, 32, 1000
    key = jax.random.PRNGKey(0)
    hidden = jax.random.normal(key, (B, T, H), jnp.float32)

    model = CaptionModel(hidden_size=H, vocab_size=V, seed=0)

    # dispatcher call, identical to the PyTorch module's forward(mode='forward')
    logprobs = model(hidden, mode="forward")
    logprobs = jax.block_until_ready(logprobs)
    assert logprobs.shape == (B, T, V)

    # sanity 1: log_softmax rows must exp-sum to ~1 (padding masked correctly)
    row_sums = jnp.sum(jnp.exp(logprobs), axis=-1)
    assert bool(jnp.all(jnp.abs(row_sums - 1.0) < 1e-3)), "row sums off"

    # sanity 2: match a pure-JAX f32 reference (bf16 matmul tolerance)
    ref_logits = hidden.reshape(B * T, H) @ model.weight + model.bias
    ref = jax.nn.log_softmax(ref_logits, axis=-1).reshape(B, T, V)
    max_err = float(jnp.max(jnp.abs(logprobs - ref)))
    assert max_err < 5e-2, f"mismatch vs reference: {max_err}"

    print("KERNEL_OK")
</pallas_src>

<mosaic_0001>
module attributes {stable_mosaic.version = 11 : i64} {
  func.func @_caption_head_kernel(%arg0: i32, %arg1: i32, %arg2: memref<16x32xbf16, #tpu.memory_space<vmem>>, %arg3: memref<32x512xbf16, #tpu.memory_space<vmem>>, %arg4: memref<1x512xf32, #tpu.memory_space<vmem>>, %arg5: memref<16x1024xf32, #tpu.memory_space<vmem>>, %arg6: memref<16x1xf32, #tpu.memory_space<vmem>>, %arg7: memref<16x1xf32, #tpu.memory_space<vmem>>) attributes {dimension_semantics = [#tpu.dimension_semantics<parallel>, #tpu.dimension_semantics<arbitrary>], iteration_bounds = array<i64: 1, 2>, scalar_prefetch = 0 : i64, scratch_operands = 2 : i64, tpu.core_type = #tpu.core_type<tc>, window_params = [{transform_indices = @transform_0, window_bounds = array<i64: 16, 32>}, {transform_indices = @transform_1, window_bounds = array<i64: 32, 512>}, {transform_indices = @transform_2, window_bounds = array<i64: 1, 512>}, {transform_indices = @transform_3, window_bounds = array<i64: 16, 1024>}]} {
    %c0_i32 = arith.constant 0 : i32
    %0 = arith.cmpi eq, %arg1, %c0_i32 : i32
    %1 = arith.extui %0 : i1 to i32
    %c0_i32_0 = arith.constant 0 : i32
    %2 = arith.cmpi ne, %1, %c0_i32_0 : i32
    scf.if %2 {
      %cst_18 = arith.constant 0xFF800000 : f32
      %32 = vector.broadcast %cst_18 : f32 to vector<16x1xf32>
      %c0_19 = arith.constant 0 : index
      %c0_20 = arith.constant 0 : index
      %33 = vector.load %arg6[%c0_19, %c0_20] : memref<16x1xf32, #tpu.memory_space<vmem>>, vector<16x1xf32>
      tpu.vector_store %arg6[%c0_19, %c0_20], %32 {strides = array<i32>} : memref<16x1xf32, #tpu.memory_space<vmem>>, vector<16x1xf32>,
      %cst_21 = arith.constant 0.000000e+00 : f32
      %34 = vector.broadcast %cst_21 : f32 to vector<16x1xf32>
      %c0_22 = arith.constant 0 : index
      %c0_23 = arith.constant 0 : index
      %35 = vector.load %arg7[%c0_22, %c0_23] : memref<16x1xf32, #tpu.memory_space<vmem>>, vector<16x1xf32>
      tpu.vector_store %arg7[%c0_22, %c0_23], %34 {strides = array<i32>} : memref<16x1xf32, #tpu.memory_space<vmem>>, vector<16x1xf32>,
    } else {
    }
    %c0 = arith.constant 0 : index
    %c0_1 = arith.constant 0 : index
    %3 = vector.load %arg2[%c0, %c0_1] : memref<16x32xbf16, #tpu.memory_space<vmem>>, vector<16x32xbf16>
    %c0_2 = arith.constant 0 : index
    %c0_3 = arith.constant 0 : index
    %4 = vector.load %arg3[%c0_2, %c0_3] : memref<32x512xbf16, #tpu.memory_space<vmem>>, vector<32x512xbf16>
    %cst = arith.constant dense<0.000000e+00> : vector<16x512xf32>
    %5 = tpu.matmul %3, %4, %cst {dimension_numbers = #tpu.dot_dimension_numbers<[1], [0], [0], [1], [0, 0, 1, 1], [], []>} : vector<16x32xbf16>, vector<32x512xbf16>, vector<16x512xf32> -> vector<16x512xf32>
    %c0_4 = arith.constant 0 : index
    %c0_5 = arith.constant 0 : index
    %6 = vector.load %arg4[%c0_4, %c0_5] : memref<1x512xf32, #tpu.memory_space<vmem>>, vector<1x512xf32>
    %7 = vector.broadcast %6 : vector<1x512xf32> to vector<16x512xf32>
    %8 = arith.addf %5, %7 : vector<16x512xf32>
    %c0_6 = arith.constant 0 : index
    %c0_7 = arith.constant 0 : index
    %9 = vector.load %arg6[%c0_6, %c0_7] : memref<16x1xf32, #tpu.memory_space<vmem>>, vector<16x1xf32>
    %cst_8 = arith.constant dense<0xFF800000> : vector<16xf32>
    %10 = vector.multi_reduction <maximumf>, %8, %cst_8 [1] : vector<16x512xf32> to vector<16xf32>
    %11 = vector.shape_cast %10 : vector<16xf32> to vector<16x1xf32>
    %12 = arith.maximumf %9, %11 : vector<16x1xf32>
    %13 = arith.subf %9, %12 : vector<16x1xf32>
    %14 = math.exp %13 : vector<16x1xf32>
    %c0_9 = arith.constant 0 : index
    %c0_10 = arith.constant 0 : index
    %15 = vector.load %arg7[%c0_9, %c0_10] : memref<16x1xf32, #tpu.memory_space<vmem>>, vector<16x1xf32>
    %16 = arith.mulf %14, %15 : vector<16x1xf32>
    %17 = vector.broadcast %12 : vector<16x1xf32> to vector<16x512xf32>
    %18 = arith.subf %8, %17 : vector<16x512xf32>
    %19 = math.exp %18 : vector<16x512xf32>
    %cst_11 = arith.constant dense<0.000000e+00> : vector<16xf32>
    %20 = vector.multi_reduction <add>, %19, %cst_11 [1] : vector<16x512xf32> to vector<16xf32>
    %21 = vector.shape_cast %20 : vector<16xf32> to vector<16x1xf32>
    %22 = arith.addf %16, %21 : vector<16x1xf32>
    %c0_12 = arith.constant 0 : index
    %c0_13 = arith.constant 0 : index
    %23 = vector.load %arg7[%c0_12, %c0_13] : memref<16x1xf32, #tpu.memory_space<vmem>>, vector<16x1xf32>
    tpu.vector_store %arg7[%c0_12, %c0_13], %22 {strides = array<i32>} : memref<16x1xf32, #tpu.memory_space<vmem>>, vector<16x1xf32>,
    %c0_14 = arith.constant 0 : index
    %c0_15 = arith.constant 0 : index
    %24 = vector.load %arg6[%c0_14, %c0_15] : memref<16x1xf32, #tpu.memory_space<vmem>>, vector<16x1xf32>
    tpu.vector_store %arg6[%c0_14, %c0_15], %12 {strides = array<i32>} : memref<16x1xf32, #tpu.memory_space<vmem>>, vector<16x1xf32>,
    %c512_i32 = arith.constant 512 : i32
    %25 = arith.muli %arg1, %c512_i32 : i32
    %26 = tpu.assume_multiple %25, 128 : i32
    %c0_16 = arith.constant 0 : index
    %27 = arith.index_cast %26 : i32 to index
    %28 = vector.load %arg5[%c0_16, %27] : memref<16x1024xf32, #tpu.memory_space<vmem>>, vector<16x512xf32>
    tpu.vector_store %arg5[%c0_16, %27], %8 {strides = array<i32>} : memref<16x1024xf32, #tpu.memory_space<vmem>>, vector<16x512xf32>,
    %c1_i32 = arith.constant 1 : i32
    %29 = arith.cmpi eq, %arg1, %c1_i32 : i32
    %30 = arith.extui %29 : i1 to i32
    %c0_i32_17 = arith.constant 0 : i32
    %31 = arith.cmpi ne, %30, %c0_i32_17 : i32
    scf.if %31 {
      %c0_18 = arith.constant 0 : index
      %c0_19 = arith.constant 0 : index
      %32 = vector.load %arg6[%c0_18, %c0_19] : memref<16x1xf32, #tpu.memory_space<vmem>>, vector<16x1xf32>
      %c0_20 = arith.constant 0 : index
      %c0_21 = arith.constant 0 : index
      %33 = vector.load %arg7[%c0_20, %c0_21] : memref<16x1xf32, #tpu.memory_space<vmem>>, vector<16x1xf32>
      %34 = math.log %33 : vector<16x1xf32>
      %35 = arith.addf %32, %34 : vector<16x1xf32>
      %c0_22 = arith.constant 0 : index
      %c0_23 = arith.constant 0 : index
      %36 = vector.load %arg5[%c0_22, %c0_23] : memref<16x1024xf32, #tpu.memory_space<vmem>>, vector<16x1024xf32>
      %37 = vector.broadcast %35 : vector<16x1xf32> to vector<16x1024xf32>
      %38 = arith.subf %36, %37 : vector<16x1024xf32>
      %c0_24 = arith.constant 0 : index
      %c0_25 = arith.constant 0 : index
      %39 = vector.load %arg5[%c0_24, %c0_25] : memref<16x1024xf32, #tpu.memory_space<vmem>>, vector<16x1024xf32>
      tpu.vector_store %arg5[%c0_24, %c0_25], %38 {strides = array<i32>} : memref<16x1024xf32, #tpu.memory_space<vmem>>, vector<16x1024xf32>,
    } else {
    }
    return
  }
  func.func @transform_0(%arg0: i32, %arg1: i32) -> (i32, i32) {
    %c0_i32 = arith.constant 0 : i32
    %c0_i32_0 = arith.constant 0 : i32
    return %arg0, %c0_i32 : i32, i32
  }
  func.func @transform_1(%arg0: i32, %arg1: i32) -> (i32, i32) {
    %c0_i32 = arith.constant 0 : i32
    %c0_i32_0 = arith.constant 0 : i32
    return %c0_i32, %arg1 : i32, i32
  }
  func.func @transform_2(%arg0: i32, %arg1: i32) -> (i32, i32) {
    %c0_i32 = arith.constant 0 : i32
    %c0_i32_0 = arith.constant 0 : i32
    return %c0_i32, %arg1 : i32, i32
  }
  func.func @transform_3(%arg0: i32, %arg1: i32) -> (i32, i32) {
    %c0_i32 = arith.constant 0 : i32
    %c0_i32_0 = arith.constant 0 : i32
    return %arg0, %c0_i32 : i32, i32
  }
}

</mosaic_0001>

<bundles_post_ra>
// kernel: _caption_head_impl.1
= control target key start
LH: loop header
LB: loop body
LE: loop exit
PB: predicated region body
PF: predicated region fallthrough
CT: control target
= control target key end

     0   :  { %8 = vsyncpa [#allocation5], 0  ;;  %s1141_s0 = inlined_call_operand.vmem [shape: bf16[16,32], index: 0, kind: input, shape index: {}]   ;;  %s1142_s1 = inlined_call_operand.hbm [shape: bf16[32,1024], index: 1, kind: input, shape index: {}]   ;;  %s1143_s2 = inlined_call_operand.vmem [shape: f32[1,1024], index: 2, kind: input, shape index: {}]   ;;  %s1144_s3 = inlined_call_operand.hbm [shape: f32[16,1024], index: 3, kind: output, shape index: {}]  }
   0x1   :  { %10 = vsyncpa [#allocation5 + $0x1], 0 }
   0x2   :  { %11 = vsyncpa [#allocation6], 0  ;;  %s958_s12 = smov 0   ;;  %s960_s13 = smov 0  }
   0x3   :  { %s962_s14 = smov 0   ;;  %s964_s15 = smov 0  }
   0x4   :  { %s966_s16 = smov 0   ;;  %s968_s17 = smov 0  }
   0x5 LB: > { %s674_s18 = sadd.s32 4294967295, %s925_s17   ;;  %s26_s19 = sadd.s32 1, %s921_s16  ;;  %s925_s17 = sphi %s968_s17, %s17_s17   ;;  %s921_s16 = sphi %s966_s16, %s1154_s16   ;;  %s917_s15 = sphi %s964_s15, %s1153_s15   ;;  %s913_s14 = sphi %s962_s14, %s1152_s14   ;;  %s909_s13 = sphi %s960_s13, %s1151_s13   ;;  %s905_s12 = sphi %s958_s12, %s1150_s12  }
   0x6   : > { %p27_p0 = scmp.ge.s32.totalorder %s26_s19, 2  ;;  %s62_s20 = sadd.s32 1, %s913_s14 }
   0x7   : > { %p69_p1 = scmp.ne.s32.totalorder %s913_s14, %s909_s13  ;;  %p70_p2 = scmp.eq.s32.totalorder %s925_s17, 0 }
   0x8   : > { %s1156_s19 = smov (%p27_p0, %s26_s19), 0  ;;  %p75_p4 = scmp.ne.s32.totalorder %s909_s13, %s905_s12 }
   0x9   : > { %p994_p3 = por %p70_p2, %p69_p1  ;;  %s59_s22 = ssub.s32 %s921_s16, %s1156_s19 }
   0xa   : > { %p76_p5 = scmp.eq.s32.totalorder %s674_s18, 0  ;;  %p60_p6 = scmp.eq.s32.totalorder %s59_s22, 0 }
   0xb   : > { %p714_p8 = scmp.lt.s32.totalorder %s925_s17, 2  ;;  %s160_s25 = sand.u32 1, %s913_s14  }
   0xc   : > { %p1003_p7 = por %p76_p5, %p75_p4  ;;  %s703_s26 = sshll.u32 %s921_s16, 8 }
   0xd   : > { %s1009_s24 = scalar_select %p60_p6, %s913_s14, %s62_s20  }
   0xe   : > { %s678_s27 = sshll.u32 %s160_s25, 6  ;;  %s1016_s30 = scalar_lea.hbm %s1142_s1, %s703_s26 }
   0xf   : > { %s164_s4 = scalar_lea.vmem [#allocation4], %s678_s27  ;;  %p1020_p9 = pnand %p714_p8, %p994_p3 }
  0x10   : > { %s171_s5 = sshll.u32 %s164_s4, 4  ;;  %s1027_s7 = scalar_lea.sflag [#allocation5], %s160_s25  ;;  %s1024_s5 = int_to_ptr.vmem [resolvable:$true] %s171_s5 }
  0x11   : > { %s815_s8 = scalar_lea.hbm %s1016_s30, 1024  ;;  %p817_p12 = pneg %p1020_p9 }
  0x12   : > { %p816_p11 = scmp.ne.s32.totalorder %s1016_s30, %s815_s8  ;;  %s820_s11 = scalar_lea.hbm %s1142_s1, 2048 }
  0x13   : > { %p821_p1 = scmp.lt.u32.totalorder %s1016_s30, %s1142_s1  ;;  %p822_p2 = scmp.lt.u32.totalorder %s820_s11, %s815_s8 }
  0x14   : > { %p818_p13 = pnand %p817_p12, %p816_p11  ;;  %p824_p4 = scmp.lt.u32.totalorder %s815_s8, %s1016_s30 }
  0x15   : > { %p823_p3 = por %p822_p2, %p821_p1 }
  0x16   : > { %p819_p0 = pneg %p818_p13 }
  0x17   : > { %p825_p5 = por %p824_p4, %p823_p3 }
  0x19   : > { %p826_p6 = pnand %p825_p5, %p819_p0 }
  0x1b   : > { %829 = shalt.err (!%p826_p6)
}
  0x1c   : > { %s830_s21 = scalar_lea.vmem %s1024_s5, 1024  ;;  %s927_s22 = smov [#allocation4]  }
  0x1d   : > { %p831_p8 = scmp.ne.s32.totalorder %s1024_s5, %s830_s21  ;;  %s835_s25 = sshll.u32 %s927_s22, 4  ;;  %s836_s25 = int_to_ptr.vmem [resolvable:$false] %s835_s25 }
  0x1e   : > { %s837_s26 = scalar_lea.vmem %s836_s25, 2048  ;;  %p838_p10 = scmp.lt.s32.totalorder %s1024_s5, %s836_s25 }
  0x1f   : > { %p833_p11 = pnand %p831_p8, %p817_p12  ;;  %p839_p1 = scmp.lt.s32.totalorder %s837_s26, %s830_s21 }
  0x21   : > { %p834_p13 = pneg %p833_p11  ;;  %p840_p2 = por %p839_p1, %p838_p10 }
  0x23   : > { %p841_p3 = pnand %p840_p2, %p834_p13 }
  0x25   : > { %844 = shalt.err (!%p841_p3)
}
  0x26   : > { %s928_s27 = smov 512   ;;  %s929_s28 = smov 256  }
  0x27   : > { %s930_s29 = smov 16   ;;  %p187_p12 = scmp.lt.s32.totalorder %s925_s17, 3 }
  0x28   : > { %713 = dma.hbm_to_vmem [thread:$0]  (!%p1020_p9), %s1016_s30, 1024, %s1024_s5, %s1027_s7, %s928_s27, %s929_s28, %s930_s29  }
  0x29   : > { %p1148_p0 = scmp.ge.s32.totalorder %s925_s17, 1 }
  0x2b   : > { %p188_p4 = pnand %p1148_p0, %p187_p12 }
  0x2c   : > { %s193_s4 = sand.u32 (!%p188_p4), 1, %s909_s13  }
  0x2d   : > { %191 = sbr.rel (%p188_p4) target bundleno = 917 (0x395), region = 32  ;;  %s682_s8 = sshll.u32 (!%p188_p4), %s193_s4, 6 }
  0x2e   : > { %s194_s9 = scalar_lea.sflag (!%p188_p4), [#allocation5], %s193_s4  ;;  %s1059_s10 = scalar_lea.vmem (!%p188_p4), [#allocation4], %s682_s8 }
  0x34   : > { %896 = dma.done.wait (%p1003_p7), %s194_s9, 1024  }
  0x35   : > { %898 = vsyncadd (%p1003_p7), %s194_s9, 4294966272  ;;  %s683_s11 = sshll.u32 %s917_s15, 2  ;;  %p684_p9 = scmp.ne.s32.totalorder %s917_s15, 0 }
  0x36   : > { %p232_p10 = scmp.lt.s32.totalorder %s683_s11, 7  ;;  %vm242_vm0 = vcmask (!%p684_p9), 7168   ;;  %v931_v0 = vmov (!%p684_p9), -inf   ;;  %v932_v1 = vmov (!%p684_p9), 0.0  }
  0x37   : > { %241 = sbr.rel (%p684_p9) target bundleno = 62 (0x3e), region = 40  ;;  %243 = vst.msk [vmem:[#allocation2] sm:$0xff] (!%p684_p9), %vm242_vm0, %v931_v0  ;;  %244 = vst.msk [vmem:[#allocation2 + $0x8] sm:$0xff] (!%p684_p9), %vm242_vm0, %v931_v0 }
  0x38   : > { %s1158_s11 = smov (!%p232_p10, %s683_s11), 7  ;;  %245 = vst.msk [vmem:[#allocation3] sm:$0xff] (!%p684_p9), %vm242_vm0, %v932_v1  ;;  %246 = vst.msk [vmem:[#allocation3 + $0x8] sm:$0xff] (!%p684_p9), %vm242_vm0, %v932_v1 }
  0x39   : > { %s234_s6 = scalar_lea.vmem %s1143_s2, %s1158_s11 }
  0x3e PF: > { %v777_v2 = vld [vmem:[%s1059_s10 + $0x4] ss:$16 sps:$4 sm:$0xff]   ;;  %v779_v3 = vld [vmem:[%s1059_s10 + $0xc] ss:$16 sps:$4 sm:$0xff]   ;;  %v933_v4 = vmov 0   ;;  %vm324_vm1 = vcmask 261120   ;;  %v259_v12 = vlaneseq }
  0x3f   : > { %360 = vmatprep.mubr.bf16.mxu0 %v933_v4  ;;  %403 = vmatprep.mubr.bf16.mxu1 %v933_v4  ;;  %v781_v5 = vld [vmem:[%s1059_s10] ss:$16 sps:$4 sm:$0xff]   ;;  %v782_v6 = vld [vmem:[%s1059_s10 + $0x8] ss:$16 sps:$4 sm:$0xff]   ;;  %v783_v7 = vld [vmem:[%s1059_s10 + $0x24] ss:$16 sps:$4 sm:$0xff]  }
  0x40   : > { %328 = vmatprep.subr.bf16.mxu0 %v777_v2  ;;  %775 = vset.pattern.permute.xlu1 %v933_v4  ;;  %v785_v8 = vld [vmem:[%s1059_s10 + $0x2c] ss:$16 sps:$4 sm:$0xff]   ;;  %v787_v9 = vld [vmem:[%s1059_s10 + $0x20] ss:$16 sps:$4 sm:$0xff]   ;;  %v788_v10 = vld [vmem:[%s1059_s10 + $0x28] ss:$16 sps:$4 sm:$0xff]  }
  0x41   : > { %371 = vmatprep.subr.bf16.mxu1 %v779_v3  ;;  %776 = vset.pattern.permute.xlu0 %v933_v4  ;;  %v789_v11 = vld [vmem:[%s1141_s0] sm:$0xff]   ;;  %v260_v13 = vshrl.u32 %v259_v12, 7  ;;  %s696_s12 = sshll.u32 %s917_s15, 9  ;;  %vm484_vm2 = vcmask 7168   ;;  %v415_v48 = vld [vmem:[#allocation2 + $0x8] sm:$0xff]  ;;  %p698_p7 = scmp.ne.s32.totalorder %s917_s15, 1 }
  0x42   : > { %329 = vmatpush1.bf16.msra.mxu0 %v781_v5  ;;  %372 = vmatpush1.bf16.msra.mxu1 %v782_v6  ;;  %v257_v16 = vld [vmem:[%s234_s6] sm:$0xf]  ;;  %s490_s22 = sshra.s32 %s696_s12, 7 }
  0x43   : > { %330 = vmatprep.subr.bf16.mxu0 %v783_v7  ;;  %373 = vmatprep.subr.bf16.mxu1 %v785_v8  ;;  %v261_v14 = vsub.s32 0, %v260_v13  ;;  %v269_v15 = vsub.s32 2, %v260_v13  ;;  %v265_v17 = vsub.s32 1, %v260_v13  ;;  %v273_v18 = vsub.s32 3, %v260_v13  ;;  %s697_s25 = sshll.u32 %s490_s22, 3  ;;  %v414_v45 = vld [vmem:[#allocation2] sm:$0xff] }
  0x44   : > { %s493_s26 = scalar_lea.vmem [#allocation7], %s697_s25 }
  0x45   : > { %v262_v19 = vrot.slane %v257_v16, %v261_v14  ;;  %v270_v20 = vrot.slane %v257_v16, %v269_v15  ;;  %v266_v21 = vrot.slane %v257_v16, %v265_v17  ;;  %v274_v22 = vrot.slane %v257_v16, %v273_v18 }
  0x46   : > { %331 = vmatpush1.bf16.msra.mxu0 %v787_v9  ;;  %374 = vmatpush1.bf16.msra.mxu1 %v788_v10 }
  0x49   : > { %694 = vmatmul.mubr.msk.bf16.vlgmr.msra.gmra.mrb[0].mxu0 %vm324_vm1, %v789_v11  ;;  %695 = vmatmul.mubr.msk.bf16.vlgmr.msra.gmra.mrb[0].mxu1 %vm324_vm1, %v789_v11 }
 0x11c   : > { %v362_v23 = vpop.f32.mrb[0].mxu0  ;;  %v405_v24 = vpop.f32.mrb[0].mxu1 }
 0x11d   : > { %v363_v25 = vadd.f32 %v362_v23, %v262_v19  ;;  %v406_v26 = vadd.f32 %v405_v24, %v270_v20  ;;  %v364_v27 = vpop.f32.mrb[1].mxu0  ;;  %v407_v28 = vpop.f32.mrb[1].mxu1  ;;  %v434_v24 = vld [vmem:[#allocation3] sm:$0xff] }
 0x11e   : > { %v365_v29 = vadd.f32 %v364_v27, %v266_v21  ;;  %v408_v30 = vadd.f32 %v407_v28, %v274_v22  ;;  %v366_v31 = vpop.f32.mrb[2].mxu0  ;;  %v409_v32 = vpop.f32.mrb[2].mxu1  ;;  %v435_v28 = vld [vmem:[#allocation3 + $0x8] sm:$0xff] }
 0x11f   : > { %494 = vst [vmem:[%s493_s26] sm:$0xff] %v363_v25  ;;  %496 = vst [vmem:[%s493_s26 + $0x10] sm:$0xff] %v406_v26  ;;  %v367_v33 = vadd.f32 %v366_v31, %v262_v19  ;;  %v410_v34 = vadd.f32 %v409_v32, %v270_v20  ;;  %v368_v35 = vpop.f32.mrb[3].mxu0  ;;  %v411_v36 = vpop.f32.mrb[3].mxu1  ;;  %v416_v37 = vmax.f32 %v363_v25, %v406_v26 }
 0x120   : > { %495 = vst [vmem:[%s493_s26 + $0x8] sm:$0xff] %v365_v29  ;;  %497 = vst [vmem:[%s493_s26 + $0x18] sm:$0xff] %v408_v30  ;;  %v369_v38 = vadd.f32 %v368_v35, %v266_v21  ;;  %v412_v39 = vadd.f32 %v411_v36, %v274_v22  ;;  %v417_v40 = vmax.f32 %v365_v29, %v408_v30 }
 0x121   : > { %498 = vst [vmem:[%s493_s26 + $0x40] sm:$0xff] %v367_v33  ;;  %500 = vst [vmem:[%s493_s26 + $0x50] sm:$0xff] %v410_v34  ;;  %v421_v42 = vmax.f32 %v367_v33, %v410_v34 }
 0x122   : > { %499 = vst [vmem:[%s493_s26 + $0x48] sm:$0xff] %v369_v38  ;;  %501 = vst [vmem:[%s493_s26 + $0x58] sm:$0xff] %v412_v39  ;;  %v418_v41 = vmax.f32 %v416_v37, %v417_v40  ;;  %v422_v43 = vmax.f32 %v369_v38, %v412_v39 }
 0x124   : > { %419 = vmax.xlane.f32.xlu0 %v418_v41  ;;  %v423_v44 = vmax.f32 %v421_v42, %v422_v43 }
 0x128   : > { %424 = vmax.xlane.f32.xlu0 %v423_v44 }
 0x129   : > { %v516_v44 = vld [vmem:[#allocation7] sm:$0xff] (!%p698_p7) }
 0x1b1   : > { %v420_v46 = vpop.xlane.xlu0 %419 }
 0x1b2   : > { %v426_v47 = vmax.f32 %v414_v45, %v420_v46  ;;  %v518_v46 = vld [vmem:[#allocation7 + $0x10] sm:$0xff] (!%p698_p7) }
 0x1b4   : > { %v428_v49 = vsub.f32 %v414_v45, %v426_v47  ;;  %487 = vst.msk [vmem:[#allocation2] sm:$0xff] %vm484_vm2, %v426_v47  ;;  %440 = vperm.xlu1 %775, %v426_v47   ;;  %v517_v45 = vld [vmem:[#allocation7 + $0x8] sm:$0xff] (!%p698_p7)  ;;  %v519_v47 = vld [vmem:[#allocation7 + $0x18] sm:$0xff] (!%p698_p7) }
 0x1b5   : > { %v425_v50 = vpop.xlane.xlu0 %424 }
 0x1b6   : > { %v427_v51 = vmax.f32 %v415_v48, %v425_v50  ;;  %v430_v21 = vmul.f32 1.442695, %v428_v49  ;;  %v521_v49 = vld [vmem:[#allocation7 + $0x28] sm:$0xff] (!%p698_p7)  ;;  %v522_v50 = vld [vmem:[#allocation7 + $0x30] sm:$0xff] (!%p698_p7) }
 0x1b8   : > { %v429_v52 = vsub.f32 %v415_v48, %v427_v51  ;;  %488 = vst.msk [vmem:[#allocation2 + $0x8] sm:$0xff] %vm484_vm2, %v427_v51  ;;  %445 = vperm.xlu1 %775, %v427_v51   ;;  %v520_v48 = vld [vmem:[#allocation7 + $0x20] sm:$0xff] (!%p698_p7)  ;;  %v523_v51 = vld [vmem:[#allocation7 + $0x38] sm:$0xff] (!%p698_p7) }
 0x1ba   : > { %v432_v22 = vmul.f32 1.442695, %v429_v52 }
 0x1bb   : > { %v506_v37 = vld [vmem:[#allocation2] sm:$0xff] (!%p698_p7) }
 0x1bf   : > { %v507_v40 = vld [vmem:[#allocation2 + $0x8] sm:$0xff] (!%p698_p7) }
 0x233   : > { %v441_v53 = vpop.permute.xlu1 %440 }
 0x234   : > { %v448_v54 = vsub.f32 %v363_v25, %v441_v53  ;;  %v449_v55 = vsub.f32 %v365_v29, %v441_v53  ;;  %v450_v56 = vsub.f32 %v406_v26, %v441_v53  ;;  %v451_v57 = vsub.f32 %v408_v30, %v441_v53 }
 0x236   : > { %v456_v58 = vmul.f32 1.442695, %v448_v54  ;;  %v458_v59 = vmul.f32 1.442695, %v449_v55  ;;  %v460_v60 = vmul.f32 1.442695, %v450_v56 }
 0x237   : > { %v462_v61 = vmul.f32 1.442695, %v451_v57  ;;  %v446_v62 = vpop.permute.xlu1 %445  ;;  %v524_v57 = vld [vmem:[#allocation7 + $0x40] sm:$0xff] (!%p698_p7) }
 0x238   : > { %790 = vpow2.f32 %v456_v58  ;;  %v452_v63 = vsub.f32 %v367_v33, %v446_v62  ;;  %v453_v0 = vsub.f32 %v369_v38, %v446_v62  ;;  %v454_v1 = vsub.f32 %v410_v34, %v446_v62  ;;  %v525_v58 = vld [vmem:[#allocation7 + $0x48] sm:$0xff] (!%p698_p7) }
 0x239   : > { %792 = vpow2.f32 %v458_v59  ;;  %v455_v2 = vsub.f32 %v412_v39, %v446_v62  ;;  %v934_v34 = vmov (!%p698_p7), 0  }
 0x23a   : > { %794 = vpow2.f32 %v460_v60  ;;  %v464_v3 = vmul.f32 1.442695, %v452_v63  ;;  %v466_v4 = vmul.f32 1.442695, %v453_v0  ;;  %v468_v5 = vmul.f32 1.442695, %v454_v1  ;;  %810 = vset.pattern.permute.xlu0 (!%p698_p7), %v934_v34 }
 0x23b   : > { %796 = vpow2.f32 %v462_v61  ;;  %v470_v6 = vmul.f32 1.442695, %v455_v2  ;;  %v526_v63 = vld [vmem:[#allocation7 + $0x50] sm:$0xff] (!%p698_p7)  ;;  %v527_v0 = vld [vmem:[#allocation7 + $0x58] sm:$0xff] (!%p698_p7)  ;;  %v528_v1 = vld [vmem:[#allocation7 + $0x60] sm:$0xff] (!%p698_p7) }
 0x23c   : > { %798 = vpow2.f32 %v464_v3  ;;  %v529_v2 = vld [vmem:[#allocation7 + $0x68] sm:$0xff] (!%p698_p7)  ;;  %v530_v3 = vld [vmem:[#allocation7 + $0x70] sm:$0xff] (!%p698_p7) }
 0x23d   : > { %800 = vpow2.f32 %v466_v4  ;;  %v531_v4 = vld [vmem:[#allocation7 + $0x78] sm:$0xff] (!%p698_p7) }
 0x23e   : > { %802 = vpow2.f32 %v468_v5 }
 0x23f   : > { %804 = vpow2.f32 %v470_v6 }
 0x240   : > { %806 = vpow2.f32 %v430_v21 }
 0x241   : > { %808 = vpow2.f32 %v432_v22 }
 0x242   : > { %v791_v7 = vpop.eup %790 }
 0x243   : > { %v793_v8 = vpop.eup %792 }
 0x244   : > { %v795_v9 = vpop.eup %794  ;;  %v472_v10 = vadd.f32 %v793_v8, %v791_v7 }
 0x245   : > { %v797_v11 = vpop.eup %796 }
 0x246   : > { %v799_v12 = vpop.eup %798  ;;  %v473_v13 = vadd.f32 %v795_v9, %v472_v10 }
 0x247   : > { %v801_v14 = vpop.eup %800 }
 0x248   : > { %v474_v15 = vadd.f32 %v797_v11, %v473_v13  ;;  %v477_v16 = vadd.f32 %v801_v14, %v799_v12  ;;  %v803_v17 = vpop.eup %802 }
 0x249   : > { %v805_v19 = vpop.eup %804 }
 0x24a   : > { %475 = vadd.xlane.f32.xlu0 %v474_v15  ;;  %v478_v18 = vadd.f32 %v803_v17, %v477_v16  ;;  %v807_v23 = vpop.eup %806 }
 0x24b   : > { %v436_v25 = vmul.f32 %v807_v23, %v434_v24  ;;  %v809_v26 = vpop.eup %808 }
 0x24c   : > { %v479_v20 = vadd.f32 %v805_v19, %v478_v18  ;;  %v437_v30 = vmul.f32 %v809_v26, %v435_v28 }
 0x24e   : > { %480 = vadd.xlane.f32.xlu1 %v479_v20 }
 0x2d7   : > { %v476_v27 = vpop.xlane.xlu0 %475 }
 0x2d8   : > { %v482_v29 = vadd.f32 %v476_v27, %v436_v25  ;;  %505 = sbr.rel (%p698_p7) target bundleno = 891 (0x37b), region = 44 }
 0x2da   : > { %485 = vst.msk [vmem:[#allocation3] sm:$0xff] %vm484_vm2, %v482_v29 }
 0x2db   : > { %v481_v31 = vpop.xlane.xlu1 %480 }
 0x2dc   : > { %v483_v32 = vadd.f32 %v481_v31, %v437_v30 }
 0x2de   : > { %486 = vst.msk [vmem:[#allocation3 + $0x8] sm:$0xff] %vm484_vm2, %v483_v32 }
 0x2e1   : > { %v508_v33 = vld [vmem:[#allocation3] sm:$0xff] }
 0x2e2   : > { %811 = vlog2.f32 %v508_v33 }
 0x2e5   : > { %v509_v35 = vld [vmem:[#allocation3 + $0x8] sm:$0xff] }
 0x2e6   : > { %813 = vlog2.f32 %v509_v35 }
 0x2ec   : > { %v812_v36 = vpop.eup %811 }
 0x2ed   : > { %v511_v39 = vmul.f32 0.6931472, %v812_v36 }
 0x2ef   : > { %v514_v42 = vadd.f32 %v511_v39, %v506_v37 }
 0x2f0   : > { %v814_v38 = vpop.eup %813 }
 0x2f1   : > { %v513_v41 = vmul.f32 0.6931472, %v814_v38  ;;  %534 = vperm.xlu0 %810, %v514_v42  }
 0x2f3   : > { %v515_v43 = vadd.f32 %v513_v41, %v507_v40 }
 0x2f5   : > { %539 = vperm.xlu0 %810, %v515_v43  }
 0x370   : > { %v535_v52 = vpop.permute.xlu0 %534 }
 0x371   : > { %v542_v53 = vsub.f32 %v516_v44, %v535_v52  ;;  %v543_v54 = vsub.f32 %v517_v45, %v535_v52  ;;  %v544_v55 = vsub.f32 %v518_v46, %v535_v52  ;;  %v545_v56 = vsub.f32 %v519_v47, %v535_v52 }
 0x372   : > { %v546_v59 = vsub.f32 %v520_v48, %v535_v52  ;;  %v547_v60 = vsub.f32 %v521_v49, %v535_v52  ;;  %v548_v61 = vsub.f32 %v522_v50, %v535_v52  ;;  %v549_v62 = vsub.f32 %v523_v51, %v535_v52 }
 0x373   : > { %558 = vst [vmem:[#allocation7] sm:$0xff] %v542_v53  ;;  %559 = vst [vmem:[#allocation7 + $0x8] sm:$0xff] %v543_v54 }
 0x374   : > { %560 = vst [vmem:[#allocation7 + $0x10] sm:$0xff] %v544_v55  ;;  %561 = vst [vmem:[#allocation7 + $0x18] sm:$0xff] %v545_v56  ;;  %v540_v5 = vpop.permute.xlu0 %539 }
 0x375   : > { %562 = vst [vmem:[#allocation7 + $0x20] sm:$0xff] %v546_v59  ;;  %563 = vst [vmem:[#allocation7 + $0x28] sm:$0xff] %v547_v60  ;;  %v550_v6 = vsub.f32 %v524_v57, %v540_v5  ;;  %v551_v7 = vsub.f32 %v525_v58, %v540_v5  ;;  %v552_v8 = vsub.f32 %v526_v63, %v540_v5 }
 0x376   : > { %564 = vst [vmem:[#allocation7 + $0x30] sm:$0xff] %v548_v61  ;;  %565 = vst [vmem:[#allocation7 + $0x38] sm:$0xff] %v549_v62  ;;  %v553_v9 = vsub.f32 %v527_v0, %v540_v5  ;;  %v554_v10 = vsub.f32 %v528_v1, %v540_v5  ;;  %v555_v11 = vsub.f32 %v529_v2, %v540_v5 }
 0x377   : > { %v556_v12 = vsub.f32 %v530_v3, %v540_v5  ;;  %v557_v13 = vsub.f32 %v531_v4, %v540_v5  ;;  %566 = vst [vmem:[#allocation7 + $0x40] sm:$0xff] %v550_v6  ;;  %567 = vst [vmem:[#allocation7 + $0x48] sm:$0xff] %v551_v7 }
 0x378   : > { %568 = vst [vmem:[#allocation7 + $0x50] sm:$0xff] %v552_v8  ;;  %569 = vst [vmem:[#allocation7 + $0x58] sm:$0xff] %v553_v9 }
 0x379   : > { %570 = vst [vmem:[#allocation7 + $0x60] sm:$0xff] %v554_v10  ;;  %571 = vst [vmem:[#allocation7 + $0x68] sm:$0xff] %v555_v11 }
 0x37a   : > { %572 = vst [vmem:[#allocation7 + $0x70] sm:$0xff] %v556_v12  ;;  %573 = vst [vmem:[#allocation7 + $0x78] sm:$0xff] %v557_v13 }
 0x37b PF: > { %p1097_p5 = scmp.eq.s32.totalorder %s674_s18, 1  ;;  %s935_s27 = smov [#allocation7]  }
 0x37c   : > { %s584_s28 = sshll.u32 %s935_s27, 4  ;;  %s585_s28 = int_to_ptr.vmem [resolvable:$true] %s584_s28 }
 0x37d   : > { %s845_s29 = scalar_lea.vmem %s585_s28, 2048  ;;  %p852_p13 = scmp.lt.s32.totalorder %s585_s28, %s585_s28 }
 0x37e   : > { %p846_p6 = scmp.ne.s32.totalorder %s585_s28, %s845_s29  ;;  %p853_p1 = scmp.lt.s32.totalorder %s845_s29, %s845_s29 }
 0x380   : > { %p847_p8 = pnand %p846_p6, %p1097_p5  ;;  %p854_p2 = por %p853_p1, %p852_p13 }
 0x382   : > { %p848_p11 = pneg %p847_p8 }
 0x384   : > { %p855_p3 = pnand %p854_p2, %p848_p11 }
 0x386   : > { %858 = shalt.err (!%p855_p3)
}
 0x387   : > { %s859_s18 = scalar_lea.hbm %s1144_s3, 2048 }
 0x388   : > { %p860_p12 = scmp.ne.s32.totalorder %s1144_s3, %s859_s18  ;;  %p865_p10 = scmp.lt.u32.totalorder %s859_s18, %s1144_s3 }
 0x38a   : > { %p861_p0 = pnand %p860_p12, %p1097_p5 }
 0x38c   : > { %p862_p4 = pneg %p861_p0 }
 0x38e   : > { %p867_p9 = pnand %p865_p10, %p862_p4 }
 0x390   : > { %870 = shalt.err (!%p867_p9)
}
 0x391   : > { %s936_s5 = smov 1024   ;;  %s937_s6 = smov 64  }
 0x392   : > { %707 = dma.vmem_to_hbm [thread:$0]  (%p1097_p5), %s585_s28, 2048, %s1144_s3, [#allocation6], %s936_s5, %s936_s5, %s937_s6  }
 0x393   : > { %900 = dma.done.wait (%p1097_p5), [#allocation6], 2048  }
 0x394   : > { %902 = vsyncadd (%p1097_p5), [#allocation6], 4294965248 }
 0x395 PF: > { %s17_s17 = sadd.s32 1, %s925_s17   ;;  %s1150_s12 = smov %s909_s13 }
 0x396   : > { %p14_p7 = scmp.ge.s32.totalorder %s17_s17, 4   ;;  %s1151_s13 = smov %s913_s14 }
 0x397   : > { %s1152_s14 = smov %s1009_s24  ;;  %s1153_s15 = smov %s921_s16 }
 0x398   : > { %s1154_s16 = smov %s1156_s19  ;;  %16 = sbr.rel (!%p14_p7) target bundleno = 5 (0x5), region = 85 }
 0x39f   :  { %600 = vsyncpa [#allocation5], 1 }
 0x3a0   :  { %602 = vsyncpa [#allocation5 + $0x1], 1 }
 0x3a1   :  { %603 = vsyncpa [#allocation6], 1 }
 0x3a2   :  { %605 = vsyncpa [#allocation6 + $0x1], 1 }

</bundles_post_ra>
